<compile_context>
chip_gen: v7x
topology: tpu7x:2x2x1
jax: 0.10.0
libtpu: 0.0.40
codegen_flags: <defaults>
</compile_context>

<pallas_src>
import functools

import jax
import jax.numpy as jnp
from jax.experimental import pallas as pl
from jax.experimental.pallas import tpu as pltpu


# ---------------------------------------------------------------------------
# Polynomial recurrences (trace-time Python loops, order is static & small).
# ---------------------------------------------------------------------------
def _poly_basis(xn, order, polynomial):
    """Returns list of (TB, F) arrays, length order+1 (degree 0..order)."""
    p0 = jnp.ones_like(xn)
    if order == 0:
        return [p0]
    if polynomial == "Chebyshev_1":
        polys = [p0, xn]
        for _ in range(1, order):
            polys.append(2.0 * xn * polys[-1] - polys[-2])
    elif polynomial == "Chebyshev_2":
        polys = [p0, 2.0 * xn]
        for _ in range(1, order):
            polys.append(2.0 * xn * polys[-1] - polys[-2])
    elif polynomial == "Legendre":
        polys = [p0, xn]
        for n in range(1, order):
            polys.append(
                ((2.0 * n + 1.0) * xn * polys[-1] - n * polys[-2]) / (n + 1.0)
            )
    else:
        raise ValueError("Polynomial not implemented")
    return polys


def _round_up(x, m):
    return ((x + m - 1) // m) * m


# ---------------------------------------------------------------------------
# Pallas kernel: one batch tile per grid step, weights VMEM-resident.
# ---------------------------------------------------------------------------
def kan_kernel(scale_ref, offset_ref, x_ref, pw_ref, gamma_ref, beta_ref,
               lw_ref, lb_ref, o_ref,
               *, order, polynomial, ln_eps, n_real_h, mxu_dtype):
    x = x_ref[...]                                          # (TB, F) f32

    # Global min/max normalization: scalars hoisted to wrapper (SMEM) -> FMA.
    xn = x * scale_ref[0, 0] + offset_ref[0, 0]

    # Polynomial basis, degrees 0..order, fused into one lane-wide matrix.
    # Cast each degree BEFORE the concat so the lane-select/rotate traffic is
    # done at 16 bits when mxu_dtype is bf16.
    polys = _poly_basis(xn, order, polynomial)
    basis = jnp.concatenate([p.astype(mxu_dtype) for p in polys], axis=-1)

    # Single MXU contraction over F*K (pw laid out (F*K, Hp) in the wrapper),
    # bf16 operands (default), f32 accumulation.
    acc = jnp.dot(basis, pw_ref[...],
                  preferred_element_type=jnp.float32)       # (TB, Hp) f32

    # LayerNorm over the real H columns (padded acc columns are exactly 0,
    # so the sums are already exact; sum-of-squares form, no lane mask).
    inv_h = 1.0 / float(n_real_h)
    s1 = jnp.sum(acc, axis=-1, keepdims=True)
    s2 = jnp.sum(acc * acc, axis=-1, keepdims=True)
    mean = s1 * inv_h
    var = s2 * inv_h - mean * mean
    inv = jax.lax.rsqrt(var + ln_eps)
    y = (acc - mean) * (inv * gamma_ref[...]) + beta_ref[...]
    # Padded lanes: gamma/beta pads are 0 -> y is exactly 0 there.

    # SiLU activation (sigmoid on the EUP).
    y = y * jax.nn.sigmoid(y)

    # TODO(synk): dropout(p=0.2) is identity here (inference / eval mode).

    # Final Linear: y @ W_lin^T + b  (lw_ref already (Hp, Op), zero-padded).
    out = jnp.dot(y.astype(mxu_dtype), lw_ref[...],
                  preferred_element_type=jnp.float32)
    out = out + lb_ref[...]
    o_ref[...] = out.astype(o_ref.dtype)


# ---------------------------------------------------------------------------
# Wrapper: layout prep, padding, batch grid, pallas_call.
# ---------------------------------------------------------------------------
def kan_linear_no_layer(x, poly_weight, ln_gamma, ln_beta, lin_w, lin_b,
                        *, polynomial="Chebyshev_1", polynomial_order=3,
                        use_bf16_matmul=True, batch_tile=1024,
                        out_dtype=jnp.float32):
    B, F = x.shape
    H = poly_weight.shape[0]          # hidden_size == in_features
    O = lin_w.shape[0]                # out_features
    K = polynomial_order + 1
    assert poly_weight.shape == (H, F * K)

    LANE = 128
    Hp = _round_up(H, LANE)
    Op = _round_up(O, LANE)
    mxu_dtype = jnp.bfloat16 if use_bf16_matmul else jnp.float32

    # --- Global (whole-tensor) min/max normalization scalars (hoisted).
    # Correctness: this must stay a global reduction even though the kernel
    # only sees per-tile batch slices.
    xmin = jnp.min(x)
    xmax = jnp.max(x)
    scale = 2.0 / (xmax - xmin + 1e-8)
    offset = -xmin * scale - 1.0
    scale = scale.reshape(1, 1).astype(jnp.float32)
    offset = offset.reshape(1, 1).astype(jnp.float32)

    # --- Weight layouts (done once, outside the kernel).
    # W[h, f*K + k] -> pw[k*F + f, h]  (matches in-kernel concat(polys) order),
    # hidden dim zero-padded to Hp so all (B,H) vregs are lane-dense.
    pw = poly_weight.reshape(H, F, K).transpose(2, 1, 0).reshape(K * F, H)
    pw = jnp.pad(pw, ((0, 0), (0, Hp - H))).astype(mxu_dtype)
    gamma = jnp.pad(ln_gamma, (0, Hp - H)).reshape(1, Hp).astype(jnp.float32)
    beta = jnp.pad(ln_beta, (0, Hp - H)).reshape(1, Hp).astype(jnp.float32)
    lw_t = jnp.pad(lin_w.T, ((0, Hp - H), (0, Op - O))).astype(mxu_dtype)
    lb = jnp.pad(lin_b, (0, Op - O)).reshape(1, Op).astype(jnp.float32)

    # --- Batch tiling: balanced divisor, >=2 grid steps when possible so the
    # "parallel" batch axis actually spans both v7x TensorCores, and tile rows
    # aligned to 16 (bf16 sublane packing) / 8 (f32).
    align = 16 if mxu_dtype == jnp.bfloat16 else 8
    n_steps = max(1, pl.cdiv(B, batch_tile))
    if n_steps < 2 and B > align:
        n_steps = 2
    TB = _round_up(pl.cdiv(B, n_steps), align)
    Bp = _round_up(B, TB)
    grid = (Bp // TB,)
    xp = jnp.pad(x.astype(jnp.float32), ((0, Bp - B), (0, 0)))

    kernel = functools.partial(
        kan_kernel, order=polynomial_order, polynomial=polynomial,
        ln_eps=1e-5, n_real_h=H, mxu_dtype=mxu_dtype)

    smem = pl.BlockSpec(memory_space=pltpu.MemorySpace.SMEM)

    flops = 2 * Bp * (F * K) * Hp + 2 * Bp * Hp * Op
    bytes_accessed = (
        xp.size * 4 + Bp * Op * jnp.dtype(out_dtype).itemsize
        + pw.size * pw.dtype.itemsize + lw_t.size * lw_t.dtype.itemsize
        + (gamma.size + beta.size + lb.size) * 4)
    cost = pl.CostEstimate(flops=flops, transcendentals=Bp * Hp,
                           bytes_accessed=bytes_accessed)

    def build_call(single_buffer_weights):
        def const2d(shape):
            # Constant-index weights: single-buffer to halve VMEM residency
            # (no prefetch overlap is lost since the block never changes).
            if single_buffer_weights:
                return pl.BlockSpec(shape, lambda i: (0, 0),
                                    pipeline_mode=pl.Buffered(1))
            return pl.BlockSpec(shape, lambda i: (0, 0))

        in_specs = [
            smem,                                             # scale  (1,1)
            smem,                                             # offset (1,1)
            pl.BlockSpec((TB, F), lambda i: (i, 0)),          # x tile
            const2d((K * F, Hp)),                             # poly weight
            const2d((1, Hp)),                                 # LN gamma
            const2d((1, Hp)),                                 # LN beta
            const2d((Hp, Op)),                                # linear weight
            const2d((1, Op)),                                 # linear bias
        ]
        return pl.pallas_call(
            kernel,
            out_shape=jax.ShapeDtypeStruct((Bp, Op), out_dtype),
            grid=grid,
            in_specs=in_specs,
            out_specs=pl.BlockSpec((TB, Op), lambda i: (i, 0)),
            compiler_params=pltpu.CompilerParams(
                dimension_semantics=("parallel",),     # megacore on v7x
                vmem_limit_bytes=32 * 1024 * 1024,     # safe on v5e/v6e/v7x
            ),
            cost_estimate=cost,
        )

    args = (scale, offset, xp, pw, gamma, beta, lw_t, lb)
    try:
        out_p = build_call(True)(*args)
    except Exception:
        # pipeline_mode / Buffered(1) unsupported on this JAX: identical
        # semantics with default double-buffered constant blocks.
        out_p = build_call(False)(*args)

    if Bp == B and Op == O:
        return out_p
    return out_p[:B, :O]


# ---------------------------------------------------------------------------
# Pure-JAX reference (mirrors the PyTorch forward in eval mode).
# ---------------------------------------------------------------------------
def kan_reference(x, poly_weight, ln_gamma, ln_beta, lin_w, lin_b,
                  *, polynomial="Chebyshev_1", polynomial_order=3):
    xmin, xmax = jnp.min(x), jnp.max(x)
    xn = 2.0 * (x - xmin) / (xmax - xmin + 1e-8) - 1.0
    polys = _poly_basis(xn, polynomial_order, polynomial)
    basis = jnp.stack(polys, axis=-1).reshape(x.shape[0], -1)   # (B, F*K)
    po = basis @ poly_weight.T                                  # (B, H)
    mean = jnp.mean(po, axis=-1, keepdims=True)
    var = jnp.mean((po - mean) ** 2, axis=-1, keepdims=True)
    y = (po - mean) / jnp.sqrt(var + 1e-5) * ln_gamma + ln_beta
    y = y * jax.nn.sigmoid(y)                                   # SiLU
    return y @ lin_w.T + lin_b


if __name__ == "__main__":
    # Small, module-consistent shapes.
    batch = 8
    in_features = 32          # hidden_size == in_features
    out_features = 16
    polynomial_order = 3
    K = polynomial_order + 1

    key = jax.random.PRNGKey(0)
    kx, kpw, klw, klb = jax.random.split(key, 4)

    x = jax.random.normal(kx, (batch, in_features), dtype=jnp.float32)

    # poly_weight: (hidden, in_features*(order+1)), Xavier-uniform (gain=1).
    fan_in = in_features * K
    fan_out = in_features
    bound = (6.0 / (fan_in + fan_out)) ** 0.5
    poly_weight = jax.random.uniform(
        kpw, (in_features, in_features * K), jnp.float32, -bound, bound)

    # LayerNorm params (default init).
    ln_gamma = jnp.ones((in_features,), jnp.float32)
    ln_beta = jnp.zeros((in_features,), jnp.float32)

    # Final Linear params (deterministic uniform init, PyTorch-style bounds).
    lbound = 1.0 / (in_features ** 0.5)
    lin_w = jax.random.uniform(
        klw, (out_features, in_features), jnp.float32, -lbound, lbound)
    lin_b = jax.random.uniform(
        klb, (out_features,), jnp.float32, -lbound, lbound)

    # --- f32 MXU path: exact vs. reference (two polynomial families).
    for poly in ("Chebyshev_1", "Legendre"):
        out = kan_linear_no_layer(
            x, poly_weight, ln_gamma, ln_beta, lin_w, lin_b,
            polynomial=poly, polynomial_order=polynomial_order,
            use_bf16_matmul=False)
        out = jax.block_until_ready(out)
        ref = kan_reference(
            x, poly_weight, ln_gamma, ln_beta, lin_w, lin_b,
            polynomial=poly, polynomial_order=polynomial_order)
        assert out.shape == (batch, out_features)
        assert jnp.allclose(out, ref, atol=1e-4, rtol=1e-4), (
            f"{poly}: max abs err {jnp.max(jnp.abs(out - ref))}")

    # --- Default path: bf16 MXU operands, f32 accumulation (all generations).
    out_bf16 = kan_linear_no_layer(
        x, poly_weight, ln_gamma, ln_beta, lin_w, lin_b,
        polynomial="Chebyshev_1", polynomial_order=polynomial_order)
    out_bf16 = jax.block_until_ready(out_bf16)
    ref = kan_reference(
        x, poly_weight, ln_gamma, ln_beta, lin_w, lin_b,
        polynomial="Chebyshev_1", polynomial_order=polynomial_order)
    assert out_bf16.shape == (batch, out_features)
    rel = (jnp.linalg.norm(out_bf16 - ref)
           / (jnp.linalg.norm(ref) + 1e-6))
    assert bool(rel < 5e-2), f"bf16 relative error too high: {rel}"

    print("KERNEL_OK")
</pallas_src>

<mosaic_0001>
module attributes {stable_mosaic.version = 11 : i64} {
  func.func @kan_kernel(%arg0: i32, %arg1: memref<1x1xf32, #tpu.memory_space<smem>>, %arg2: memref<1x1xf32, #tpu.memory_space<smem>>, %arg3: memref<8x32xf32, #tpu.memory_space<vmem>>, %arg4: memref<128x128xf32, #tpu.memory_space<vmem>>, %arg5: memref<1x128xf32, #tpu.memory_space<vmem>>, %arg6: memref<1x128xf32, #tpu.memory_space<vmem>>, %arg7: memref<128x128xf32, #tpu.memory_space<vmem>>, %arg8: memref<1x128xf32, #tpu.memory_space<vmem>>, %arg9: memref<8x128xf32, #tpu.memory_space<vmem>>) attributes {dimension_semantics = [#tpu.dimension_semantics<parallel>], iteration_bounds = array<i64: 1>, scalar_prefetch = 0 : i64, scratch_operands = 0 : i64, tpu.core_type = #tpu.core_type<tc>, window_params = [{transform_indices = @transform_0, window_bounds = array<i64: 1, 1>}, {transform_indices = @transform_1, window_bounds = array<i64: 1, 1>}, {transform_indices = @transform_2, window_bounds = array<i64: 8, 32>}, {pipeline_mode = #tpu.pipeline_mode<synchronous>, transform_indices = @transform_3, window_bounds = array<i64: 128, 128>}, {pipeline_mode = #tpu.pipeline_mode<synchronous>, transform_indices = @transform_4, window_bounds = array<i64: 1, 128>}, {pipeline_mode = #tpu.pipeline_mode<synchronous>, transform_indices = @transform_5, window_bounds = array<i64: 1, 128>}, {pipeline_mode = #tpu.pipeline_mode<synchronous>, transform_indices = @transform_6, window_bounds = array<i64: 128, 128>}, {pipeline_mode = #tpu.pipeline_mode<synchronous>, transform_indices = @transform_7, window_bounds = array<i64: 1, 128>}, {transform_indices = @transform_8, window_bounds = array<i64: 8, 128>}]} {
    %c0 = arith.constant 0 : index
    %c0_0 = arith.constant 0 : index
    %0 = vector.load %arg3[%c0, %c0_0] : memref<8x32xf32, #tpu.memory_space<vmem>>, vector<8x32xf32>
    %c0_1 = arith.constant 0 : index
    %c0_2 = arith.constant 0 : index
    %1 = memref.load %arg1[%c0_1, %c0_2] : memref<1x1xf32, #tpu.memory_space<smem>>
    %2 = vector.broadcast %1 : f32 to vector<8x32xf32>
    %3 = arith.mulf %0, %2 : vector<8x32xf32>
    %c0_3 = arith.constant 0 : index
    %c0_4 = arith.constant 0 : index
    %4 = memref.load %arg2[%c0_3, %c0_4] : memref<1x1xf32, #tpu.memory_space<smem>>
    %5 = vector.broadcast %4 : f32 to vector<8x32xf32>
    %6 = arith.addf %3, %5 : vector<8x32xf32>
    %cst = arith.constant 1.000000e+00 : f32
    %7 = vector.broadcast %cst : f32 to vector<8x32xf32>
    %cst_5 = arith.constant 2.000000e+00 : f32
    %8 = vector.broadcast %cst_5 : f32 to vector<8x32xf32>
    %9 = arith.mulf %8, %6 : vector<8x32xf32>
    %10 = arith.mulf %9, %6 : vector<8x32xf32>
    %11 = arith.subf %10, %7 : vector<8x32xf32>
    %cst_6 = arith.constant 2.000000e+00 : f32
    %12 = vector.broadcast %cst_6 : f32 to vector<8x32xf32>
    %13 = arith.mulf %12, %6 : vector<8x32xf32>
    %14 = arith.mulf %13, %11 : vector<8x32xf32>
    %15 = arith.subf %14, %6 : vector<8x32xf32>
    %16 = tpu.concatenate %7, %6, %11, %15 in 1 : vector<8x32xf32>, vector<8x32xf32>, vector<8x32xf32>, vector<8x32xf32> -> vector<8x128xf32>
    %c0_7 = arith.constant 0 : index
    %c0_8 = arith.constant 0 : index
    %17 = vector.load %arg4[%c0_7, %c0_8] : memref<128x128xf32, #tpu.memory_space<vmem>>, vector<128x128xf32>
    %cst_9 = arith.constant dense<0.000000e+00> : vector<8x128xf32>
    %18 = tpu.matmul %16, %17, %cst_9 {dimension_numbers = #tpu.dot_dimension_numbers<[1], [0], [0], [1], [0, 0, 1, 1], [], []>} : vector<8x128xf32>, vector<128x128xf32>, vector<8x128xf32> -> vector<8x128xf32>
    %cst_10 = arith.constant dense<0.000000e+00> : vector<8xf32>
    %19 = vector.multi_reduction <add>, %18, %cst_10 [1] : vector<8x128xf32> to vector<8xf32>
    %20 = vector.shape_cast %19 : vector<8xf32> to vector<8x1xf32>
    %21 = arith.mulf %18, %18 : vector<8x128xf32>
    %cst_11 = arith.constant dense<0.000000e+00> : vector<8xf32>
    %22 = vector.multi_reduction <add>, %21, %cst_11 [1] : vector<8x128xf32> to vector<8xf32>
    %23 = vector.shape_cast %22 : vector<8xf32> to vector<8x1xf32>
    %cst_12 = arith.constant 3.125000e-02 : f32
    %24 = vector.broadcast %cst_12 : f32 to vector<8x1xf32>
    %25 = arith.mulf %20, %24 : vector<8x1xf32>
    %cst_13 = arith.constant 3.125000e-02 : f32
    %26 = vector.broadcast %cst_13 : f32 to vector<8x1xf32>
    %27 = arith.mulf %23, %26 : vector<8x1xf32>
    %28 = arith.mulf %25, %25 : vector<8x1xf32>
    %29 = arith.subf %27, %28 : vector<8x1xf32>
    %cst_14 = arith.constant 9.99999974E-6 : f32
    %30 = vector.broadcast %cst_14 : f32 to vector<8x1xf32>
    %31 = arith.addf %29, %30 : vector<8x1xf32>
    %32 = math.rsqrt %31 : vector<8x1xf32>
    %33 = vector.broadcast %25 : vector<8x1xf32> to vector<8x128xf32>
    %34 = arith.subf %18, %33 : vector<8x128xf32>
    %c0_15 = arith.constant 0 : index
    %c0_16 = arith.constant 0 : index
    %35 = vector.load %arg5[%c0_15, %c0_16] : memref<1x128xf32, #tpu.memory_space<vmem>>, vector<1x128xf32>
    %36 = vector.broadcast %32 : vector<8x1xf32> to vector<8x128xf32>
    %37 = vector.broadcast %35 : vector<1x128xf32> to vector<8x128xf32>
    %38 = arith.mulf %36, %37 : vector<8x128xf32>
    %39 = arith.mulf %34, %38 : vector<8x128xf32>
    %c0_17 = arith.constant 0 : index
    %c0_18 = arith.constant 0 : index
    %40 = vector.load %arg6[%c0_17, %c0_18] : memref<1x128xf32, #tpu.memory_space<vmem>>, vector<1x128xf32>
    %41 = vector.broadcast %40 : vector<1x128xf32> to vector<8x128xf32>
    %42 = arith.addf %39, %41 : vector<8x128xf32>
    %43 = arith.negf %42 : vector<8x128xf32>
    %44 = math.exp %43 : vector<8x128xf32>
    %cst_19 = arith.constant 1.000000e+00 : f32
    %45 = vector.broadcast %cst_19 : f32 to vector<8x128xf32>
    %46 = arith.addf %45, %44 : vector<8x128xf32>
    %47 = arith.divf %45, %46 : vector<8x128xf32>
    %48 = arith.mulf %42, %47 : vector<8x128xf32>
    %c0_20 = arith.constant 0 : index
    %c0_21 = arith.constant 0 : index
    %49 = vector.load %arg7[%c0_20, %c0_21] : memref<128x128xf32, #tpu.memory_space<vmem>>, vector<128x128xf32>
    %cst_22 = arith.constant dense<0.000000e+00> : vector<8x128xf32>
    %50 = tpu.matmul %48, %49, %cst_22 {dimension_numbers = #tpu.dot_dimension_numbers<[1], [0], [0], [1], [0, 0, 1, 1], [], []>} : vector<8x128xf32>, vector<128x128xf32>, vector<8x128xf32> -> vector<8x128xf32>
    %c0_23 = arith.constant 0 : index
    %c0_24 = arith.constant 0 : index
    %51 = vector.load %arg8[%c0_23, %c0_24] : memref<1x128xf32, #tpu.memory_space<vmem>>, vector<1x128xf32>
    %52 = vector.broadcast %51 : vector<1x128xf32> to vector<8x128xf32>
    %53 = arith.addf %50, %52 : vector<8x128xf32>
    %c0_25 = arith.constant 0 : index
    %c0_26 = arith.constant 0 : index
    %54 = vector.load %arg9[%c0_25, %c0_26] : memref<8x128xf32, #tpu.memory_space<vmem>>, vector<8x128xf32>
    tpu.vector_store %arg9[%c0_25, %c0_26], %53 {strides = array<i32>} : memref<8x128xf32, #tpu.memory_space<vmem>>, vector<8x128xf32>,
    return
  }
  func.func @transform_0(%arg0: i32) -> (i32, i32) {
    %c0_i32 = arith.constant 0 : i32
    %c0_i32_0 = arith.constant 0 : i32
    %c0_i32_1 = arith.constant 0 : i32
    return %c0_i32, %c0_i32_0 : i32, i32
  }
  func.func @transform_1(%arg0: i32) -> (i32, i32) {
    %c0_i32 = arith.constant 0 : i32
    %c0_i32_0 = arith.constant 0 : i32
    %c0_i32_1 = arith.constant 0 : i32
    return %c0_i32, %c0_i32_0 : i32, i32
  }
  func.func @transform_2(%arg0: i32) -> (i32, i32) {
    %c0_i32 = arith.constant 0 : i32
    %c0_i32_0 = arith.constant 0 : i32
    return %arg0, %c0_i32 : i32, i32
  }
  func.func @transform_3(%arg0: i32) -> (i32, i32) {
    %c0_i32 = arith.constant 0 : i32
    %c0_i32_0 = arith.constant 0 : i32
    %c0_i32_1 = arith.constant 0 : i32
    return %c0_i32, %c0_i32_0 : i32, i32
  }
  func.func @transform_4(%arg0: i32) -> (i32, i32) {
    %c0_i32 = arith.constant 0 : i32
    %c0_i32_0 = arith.constant 0 : i32
    %c0_i32_1 = arith.constant 0 : i32
    return %c0_i32, %c0_i32_0 : i32, i32
  }
  func.func @transform_5(%arg0: i32) -> (i32, i32) {
    %c0_i32 = arith.constant 0 : i32
    %c0_i32_0 = arith.constant 0 : i32
    %c0_i32_1 = arith.constant 0 : i32
    return %c0_i32, %c0_i32_0 : i32, i32
  }
  func.func @transform_6(%arg0: i32) -> (i32, i32) {
    %c0_i32 = arith.constant 0 : i32
    %c0_i32_0 = arith.constant 0 : i32
    %c0_i32_1 = arith.constant 0 : i32
    return %c0_i32, %c0_i32_0 : i32, i32
  }
  func.func @transform_7(%arg0: i32) -> (i32, i32) {
    %c0_i32 = arith.constant 0 : i32
    %c0_i32_0 = arith.constant 0 : i32
    %c0_i32_1 = arith.constant 0 : i32
    return %c0_i32, %c0_i32_0 : i32, i32
  }
  func.func @transform_8(%arg0: i32) -> (i32, i32) {
    %c0_i32 = arith.constant 0 : i32
    %c0_i32_0 = arith.constant 0 : i32
    return %arg0, %c0_i32 : i32, i32
  }
}

module attributes {stable_mosaic.version = 11 : i64} {
  func.func @kan_kernel(%arg0: i32, %arg1: memref<1x1xf32, #tpu.memory_space<smem>>, %arg2: memref<1x1xf32, #tpu.memory_space<smem>>, %arg3: memref<8x32xf32, #tpu.memory_space<vmem>>, %arg4: memref<128x128xf32, #tpu.memory_space<vmem>>, %arg5: memref<1x128xf32, #tpu.memory_space<vmem>>, %arg6: memref<1x128xf32, #tpu.memory_space<vmem>>, %arg7: memref<128x128xf32, #tpu.memory_space<vmem>>, %arg8: memref<1x128xf32, #tpu.memory_space<vmem>>, %arg9: memref<8x128xf32, #tpu.memory_space<vmem>>) attributes {dimension_semantics = [#tpu.dimension_semantics<parallel>], iteration_bounds = array<i64: 1>, scalar_prefetch = 0 : i64, scratch_operands = 0 : i64, tpu.core_type = #tpu.core_type<tc>, window_params = [{transform_indices = @transform_0, window_bounds = array<i64: 1, 1>}, {transform_indices = @transform_1, window_bounds = array<i64: 1, 1>}, {transform_indices = @transform_2, window_bounds = array<i64: 8, 32>}, {pipeline_mode = #tpu.pipeline_mode<synchronous>, transform_indices = @transform_3, window_bounds = array<i64: 128, 128>}, {pipeline_mode = #tpu.pipeline_mode<synchronous>, transform_indices = @transform_4, window_bounds = array<i64: 1, 128>}, {pipeline_mode = #tpu.pipeline_mode<synchronous>, transform_indices = @transform_5, window_bounds = array<i64: 1, 128>}, {pipeline_mode = #tpu.pipeline_mode<synchronous>, transform_indices = @transform_6, window_bounds = array<i64: 128, 128>}, {pipeline_mode = #tpu.pipeline_mode<synchronous>, transform_indices = @transform_7, window_bounds = array<i64: 1, 128>}, {transform_indices = @transform_8, window_bounds = array<i64: 8, 128>}]} {
    %c0 = arith.constant 0 : index
    %c0_0 = arith.constant 0 : index
    %0 = vector.load %arg3[%c0, %c0_0] : memref<8x32xf32, #tpu.memory_space<vmem>>, vector<8x32xf32>
    %c0_1 = arith.constant 0 : index
    %c0_2 = arith.constant 0 : index
    %1 = memref.load %arg1[%c0_1, %c0_2] : memref<1x1xf32, #tpu.memory_space<smem>>
    %2 = vector.broadcast %1 : f32 to vector<8x32xf32>
    %3 = arith.mulf %0, %2 : vector<8x32xf32>
    %c0_3 = arith.constant 0 : index
    %c0_4 = arith.constant 0 : index
    %4 = memref.load %arg2[%c0_3, %c0_4] : memref<1x1xf32, #tpu.memory_space<smem>>
    %5 = vector.broadcast %4 : f32 to vector<8x32xf32>
    %6 = arith.addf %3, %5 : vector<8x32xf32>
    %cst = arith.constant 1.000000e+00 : f32
    %7 = vector.broadcast %cst : f32 to vector<8x32xf32>
    %cst_5 = arith.constant 2.000000e+00 : f32
    %8 = vector.broadcast %cst_5 : f32 to vector<8x32xf32>
    %9 = arith.mulf %8, %6 : vector<8x32xf32>
    %10 = arith.mulf %9, %6 : vector<8x32xf32>
    %11 = arith.subf %10, %7 : vector<8x32xf32>
    %cst_6 = arith.constant 2.000000e+00 : f32
    %12 = vector.broadcast %cst_6 : f32 to vector<8x32xf32>
    %13 = arith.mulf %12, %6 : vector<8x32xf32>
    %14 = arith.mulf %13, %11 : vector<8x32xf32>
    %15 = arith.subf %14, %6 : vector<8x32xf32>
    %16 = tpu.concatenate %7, %6, %11, %15 in 1 : vector<8x32xf32>, vector<8x32xf32>, vector<8x32xf32>, vector<8x32xf32> -> vector<8x128xf32>
    %c0_7 = arith.constant 0 : index
    %c0_8 = arith.constant 0 : index
    %17 = vector.load %arg4[%c0_7, %c0_8] : memref<128x128xf32, #tpu.memory_space<vmem>>, vector<128x128xf32>
    %cst_9 = arith.constant dense<0.000000e+00> : vector<8x128xf32>
    %18 = tpu.matmul %16, %17, %cst_9 {dimension_numbers = #tpu.dot_dimension_numbers<[1], [0], [0], [1], [0, 0, 1, 1], [], []>} : vector<8x128xf32>, vector<128x128xf32>, vector<8x128xf32> -> vector<8x128xf32>
    %cst_10 = arith.constant dense<0.000000e+00> : vector<8xf32>
    %19 = vector.multi_reduction <add>, %18, %cst_10 [1] : vector<8x128xf32> to vector<8xf32>
    %20 = vector.shape_cast %19 : vector<8xf32> to vector<8x1xf32>
    %21 = arith.mulf %18, %18 : vector<8x128xf32>
    %cst_11 = arith.constant dense<0.000000e+00> : vector<8xf32>
    %22 = vector.multi_reduction <add>, %21, %cst_11 [1] : vector<8x128xf32> to vector<8xf32>
    %23 = vector.shape_cast %22 : vector<8xf32> to vector<8x1xf32>
    %cst_12 = arith.constant 3.125000e-02 : f32
    %24 = vector.broadcast %cst_12 : f32 to vector<8x1xf32>
    %25 = arith.mulf %20, %24 : vector<8x1xf32>
    %cst_13 = arith.constant 3.125000e-02 : f32
    %26 = vector.broadcast %cst_13 : f32 to vector<8x1xf32>
    %27 = arith.mulf %23, %26 : vector<8x1xf32>
    %28 = arith.mulf %25, %25 : vector<8x1xf32>
    %29 = arith.subf %27, %28 : vector<8x1xf32>
    %cst_14 = arith.constant 9.99999974E-6 : f32
    %30 = vector.broadcast %cst_14 : f32 to vector<8x1xf32>
    %31 = arith.addf %29, %30 : vector<8x1xf32>
    %32 = math.rsqrt %31 : vector<8x1xf32>
    %33 = vector.broadcast %25 : vector<8x1xf32> to vector<8x128xf32>
    %34 = arith.subf %18, %33 : vector<8x128xf32>
    %c0_15 = arith.constant 0 : index
    %c0_16 = arith.constant 0 : index
    %35 = vector.load %arg5[%c0_15, %c0_16] : memref<1x128xf32, #tpu.memory_space<vmem>>, vector<1x128xf32>
    %36 = vector.broadcast %32 : vector<8x1xf32> to vector<8x128xf32>
    %37 = vector.broadcast %35 : vector<1x128xf32> to vector<8x128xf32>
    %38 = arith.mulf %36, %37 : vector<8x128xf32>
    %39 = arith.mulf %34, %38 : vector<8x128xf32>
    %c0_17 = arith.constant 0 : index
    %c0_18 = arith.constant 0 : index
    %40 = vector.load %arg6[%c0_17, %c0_18] : memref<1x128xf32, #tpu.memory_space<vmem>>, vector<1x128xf32>
    %41 = vector.broadcast %40 : vector<1x128xf32> to vector<8x128xf32>
    %42 = arith.addf %39, %41 : vector<8x128xf32>
    %43 = arith.negf %42 : vector<8x128xf32>
    %44 = math.exp %43 : vector<8x128xf32>
    %cst_19 = arith.constant 1.000000e+00 : f32
    %45 = vector.broadcast %cst_19 : f32 to vector<8x128xf32>
    %46 = arith.addf %45, %44 : vector<8x128xf32>
    %47 = arith.divf %45, %46 : vector<8x128xf32>
    %48 = arith.mulf %42, %47 : vector<8x128xf32>
    %c0_20 = arith.constant 0 : index
    %c0_21 = arith.constant 0 : index
    %49 = vector.load %arg7[%c0_20, %c0_21] : memref<128x128xf32, #tpu.memory_space<vmem>>, vector<128x128xf32>
    %cst_22 = arith.constant dense<0.000000e+00> : vector<8x128xf32>
    %50 = tpu.matmul %48, %49, %cst_22 {dimension_numbers = #tpu.dot_dimension_numbers<[1], [0], [0], [1], [0, 0, 1, 1], [], []>} : vector<8x128xf32>, vector<128x128xf32>, vector<8x128xf32> -> vector<8x128xf32>
    %c0_23 = arith.constant 0 : index
    %c0_24 = arith.constant 0 : index
    %51 = vector.load %arg8[%c0_23, %c0_24] : memref<1x128xf32, #tpu.memory_space<vmem>>, vector<1x128xf32>
    %52 = vector.broadcast %51 : vector<1x128xf32> to vector<8x128xf32>
    %53 = arith.addf %50, %52 : vector<8x128xf32>
    %c0_25 = arith.constant 0 : index
    %c0_26 = arith.constant 0 : index
    %54 = vector.load %arg9[%c0_25, %c0_26] : memref<8x128xf32, #tpu.memory_space<vmem>>, vector<8x128xf32>
    tpu.vector_store %arg9[%c0_25, %c0_26], %53 {strides = array<i32>} : memref<8x128xf32, #tpu.memory_space<vmem>>, vector<8x128xf32>,
    return
  }
  func.func @transform_0(%arg0: i32) -> (i32, i32) {
    %c0_i32 = arith.constant 0 : i32
    %c0_i32_0 = arith.constant 0 : i32
    %c0_i32_1 = arith.constant 0 : i32
    return %c0_i32, %c0_i32_0 : i32, i32
  }
  func.func @transform_1(%arg0: i32) -> (i32, i32) {
    %c0_i32 = arith.constant 0 : i32
    %c0_i32_0 = arith.constant 0 : i32
    %c0_i32_1 = arith.constant 0 : i32
    return %c0_i32, %c0_i32_0 : i32, i32
  }
  func.func @transform_2(%arg0: i32) -> (i32, i32) {
    %c0_i32 = arith.constant 0 : i32
    %c0_i32_0 = arith.constant 0 : i32
    return %arg0, %c0_i32 : i32, i32
  }
  func.func @transform_3(%arg0: i32) -> (i32, i32) {
    %c0_i32 = arith.constant 0 : i32
    %c0_i32_0 = arith.constant 0 : i32
    %c0_i32_1 = arith.constant 0 : i32
    return %c0_i32, %c0_i32_0 : i32, i32
  }
  func.func @transform_4(%arg0: i32) -> (i32, i32) {
    %c0_i32 = arith.constant 0 : i32
    %c0_i32_0 = arith.constant 0 : i32
    %c0_i32_1 = arith.constant 0 : i32
    return %c0_i32, %c0_i32_0 : i32, i32
  }
  func.func @transform_5(%arg0: i32) -> (i32, i32) {
    %c0_i32 = arith.constant 0 : i32
    %c0_i32_0 = arith.constant 0 : i32
    %c0_i32_1 = arith.constant 0 : i32
    return %c0_i32, %c0_i32_0 : i32, i32
  }
  func.func @transform_6(%arg0: i32) -> (i32, i32) {
    %c0_i32 = arith.constant 0 : i32
    %c0_i32_0 = arith.constant 0 : i32
    %c0_i32_1 = arith.constant 0 : i32
    return %c0_i32, %c0_i32_0 : i32, i32
  }
  func.func @transform_7(%arg0: i32) -> (i32, i32) {
    %c0_i32 = arith.constant 0 : i32
    %c0_i32_0 = arith.constant 0 : i32
    %c0_i32_1 = arith.constant 0 : i32
    return %c0_i32, %c0_i32_0 : i32, i32
  }
  func.func @transform_8(%arg0: i32) -> (i32, i32) {
    %c0_i32 = arith.constant 0 : i32
    %c0_i32_0 = arith.constant 0 : i32
    return %arg0, %c0_i32 : i32, i32
  }
}

</mosaic_0001>

<bundles_post_ra>
// kernel: tpu_custom_call.1
= control target key start
LH: loop header
LB: loop body
LE: loop exit
PB: predicated region body
PF: predicated region fallthrough
CT: control target
= control target key end

     0   :  { %15 = vsyncpa [#allocation5], 0  ;;  %s744_s0 = inlined_call_operand.<no memory space> [shape: f32[1,1], index: 0, kind: input, shape index: {}]   ;;  %s745_s1 = inlined_call_operand.<no memory space> [shape: f32[1,1], index: 1, kind: input, shape index: {}]   ;;  %s746_s2 = inlined_call_operand.hbm [shape: f32[8,32], index: 2, kind: input, shape index: {}]   ;;  %s747_s3 = inlined_call_operand.hbm [shape: f32[128,128], index: 3, kind: input, shape index: {}]   ;;  %s748_s4 = inlined_call_operand.vmem [shape: f32[1,128], index: 4, kind: input, shape index: {}]   ;;  %s749_s5 = inlined_call_operand.vmem [shape: f32[1,128], index: 5, kind: input, shape index: {}]   ;;  %s750_s6 = inlined_call_operand.hbm [shape: f32[128,128], index: 6, kind: input, shape index: {}]   ;;  %s751_s7 = inlined_call_operand.vmem [shape: f32[1,128], index: 7, kind: input, shape index: {}]   ;;  %s752_s8 = inlined_call_operand.hbm [shape: f32[8,128], index: 8, kind: output, shape index: {}]  }
   0x1   :  { %16 = vsyncpa [#allocation8], 0 }
   0x2   :  { %17 = vsyncpa [#allocation6], 0  ;;  %s602_s27 = smov [#allocation7]   ;;  %s508_s9 = scalar_lea.hbm %s747_s3, 2048 }
   0x3   :  { %s37_s28 = sshll.u32 %s602_s27, 4  ;;  %p509_p0 = scmp.ne.s32.totalorder %s747_s3, %s508_s9  ;;  %s38_s28 = int_to_ptr.vmem [resolvable:$true] %s37_s28 }
   0x4   :  { %p512_p1 = scmp.lt.u32.totalorder %s508_s9, %s747_s3 }
   0x6   :  { %p514_p2 = pnand %p512_p1, %p509_p0 }
   0x8   :  { %517 = shalt.err (!%p514_p2)
}
   0x9   :  { %s518_s14 = scalar_lea.vmem %s38_s28, 2048  ;;  %p523_p4 = scmp.lt.s32.totalorder %s38_s28, %s38_s28 }
   0xa   :  { %p519_p3 = scmp.ne.s32.totalorder %s38_s28, %s518_s14  ;;  %p524_p5 = scmp.lt.s32.totalorder %s518_s14, %s518_s14 }
   0xc   :  { %p525_p6 = por %p524_p5, %p523_p4 }
   0xe   :  { %p526_p7 = pnand %p525_p6, %p519_p3 }
  0x10   :  { %529 = shalt.err (!%p526_p7)
}
  0x11   :  { %s603_s15 = smov 128   ;;  %s604_s16 = smov 8  }
  0x12   :  { %43 = dma.hbm_to_vmem [thread:$0]  %s747_s3, 2048, %s38_s28, [#allocation8], %s603_s15, %s603_s15, %s604_s16  }
  0x13   :  { %s605_s19 = smov [#allocation4]   ;;  %s606_s21 = smov [#allocation9]  }
  0x14   :  { %s28_s20 = sshll.u32 %s605_s19, 4  ;;  %s53_s22 = sshll.u32 %s606_s21, 4  ;;  %s29_s20 = int_to_ptr.vmem [resolvable:$true] %s28_s20  ;;  %s54_s22 = int_to_ptr.vmem [resolvable:$true] %s53_s22 }
  0x15   :  { %s530_s25 = scalar_lea.hbm %s746_s2, 128 }
  0x16   :  { %p531_p8 = scmp.ne.s32.totalorder %s746_s2, %s530_s25  ;;  %p534_p9 = scmp.lt.u32.totalorder %s530_s25, %s746_s2 }
  0x18   :  { %p536_p10 = pnand %p534_p9, %p531_p8 }
  0x1a   :  { %539 = shalt.err (!%p536_p10)
}
  0x1b   :  { %s540_s3 = scalar_lea.vmem %s29_s20, 128  ;;  %p545_p12 = scmp.lt.s32.totalorder %s29_s20, %s29_s20 }
  0x1c   :  { %p541_p11 = scmp.ne.s32.totalorder %s29_s20, %s540_s3  ;;  %p546_p13 = scmp.lt.s32.totalorder %s540_s3, %s540_s3 }
  0x1e   :  { %p547_p0 = por %p546_p13, %p545_p12 }
  0x20   :  { %p548_p1 = pnand %p547_p0, %p541_p11 }
  0x22   :  { %551 = shalt.err (!%p548_p1)
}
  0x23   :  { %31 = dma.hbm_to_vmem [thread:$0]  %s746_s2, 128, %s29_s20, [#allocation5]  }
  0x24   :  { %s552_s12 = scalar_lea.hbm %s750_s6, 2048 }
  0x25   :  { %p553_p2 = scmp.ne.s32.totalorder %s750_s6, %s552_s12  ;;  %p556_p3 = scmp.lt.u32.totalorder %s552_s12, %s750_s6 }
  0x27   :  { %p558_p4 = pnand %p556_p3, %p553_p2 }
  0x29   :  { %561 = shalt.err (!%p558_p4)
}
  0x2a   :  { %s562_s19 = scalar_lea.vmem %s54_s22, 2048  ;;  %p567_p6 = scmp.lt.s32.totalorder %s54_s22, %s54_s22 }
  0x2b   :  { %p563_p5 = scmp.ne.s32.totalorder %s54_s22, %s562_s19  ;;  %p568_p7 = scmp.lt.s32.totalorder %s562_s19, %s562_s19 }
  0x2d   :  { %p569_p8 = por %p568_p7, %p567_p6 }
  0x2f   :  { %p570_p9 = pnand %p569_p8, %p563_p5 }
  0x31   :  { %573 = shalt.err (!%p570_p9)
}
  0x32   :  { %59 = dma.hbm_to_vmem [thread:$0]  %s750_s6, 2048, %s54_s22, [#allocation8], %s603_s15, %s603_s15, %s604_s16  }
  0x33   :  { %596 = dma.done.wait [#allocation5], 128  }
  0x34   :  { %597 = vsyncadd [#allocation5], 4294967168 }
  0x35   :  { %598 = dma.done.wait [#allocation8], 4096  }
  0x36   :  { %599 = vsyncadd [#allocation8], 4294963200  ;;  %v607_v0 = vmov 0.0|0.0   ;;  %v73_v1 = vstv %s744_s0  ;;  %v71_v2 = vld [vmem:[#allocation4] sm:$0xff]  ;;  %v76_v3 = vstv %s745_s1  ;;  %v101_v4 = vld [vmem:[#allocation7] sm:$0xff]  ;;  %vm608_vm0 = vmmov 0  }
  0x37   :  { %442 = vmatprep.subr.bf16.mxu0 %v607_v0  ;;  %466 = vmatprep.subr.bf16.mxu1 %v607_v0  ;;  %v102_v5 = vld [vmem:[#allocation7 + $0x8] sm:$0xff]  ;;  %v74_v6 = vmul.f32 %v73_v1, %v71_v2  ;;  %v103_v8 = vld [vmem:[#allocation7 + $0x10] sm:$0xff]  ;;  %v104_v9 = vld [vmem:[#allocation7 + $0x18] sm:$0xff]  ;;  %v609_v10 = vmov 0.0   ;;  %s610_s0 = smov 32   ;;  %s611_s1 = smov 64  }
  0x38   :  { %v443_v7 = vpack.c.bf16 %v102_v5, %v101_v4  ;;  %404 = vmatprep.mubr.msk.f32.mxu0 %vm608_vm0, %v609_v10  ;;  %439 = vmatprep.mubr.msk.f32.mxu1 %vm608_vm0, %v609_v10  ;;  %v446_v12 = vpack.c.bf16 %v104_v9, %v103_v8  ;;  %v105_v13 = vld [vmem:[#allocation7 + $0x20] sm:$0xff]  ;;  %v106_v14 = vld [vmem:[#allocation7 + $0x28] sm:$0xff]  ;;  %v107_v18 = vld [vmem:[#allocation7 + $0x30] sm:$0xff]  ;;  %s612_s6 = smov 96   ;;  %vm95_vm1 = vcmask 261120   ;;  %vm97_vm2 = vcmask 523264  }
  0x39   :  { %v77_v11 = vadd.f32 %v76_v3, %v74_v6  ;;  %v449_v17 = vpack.c.bf16 %v106_v14, %v105_v13  ;;  %v108_v19 = vld [vmem:[#allocation7 + $0x38] sm:$0xff]  ;;  %v109_v23 = vld [vmem:[#allocation7 + $0x40] sm:$0xff]  ;;  %v110_v24 = vld [vmem:[#allocation7 + $0x48] sm:$0xff]  ;;  %vm99_vm3 = vcmask 785408  }
  0x3a   :  { %444 = vmatpush3.bf16.msra.mxu0 %v443_v7  ;;  %v452_v22 = vpack.c.bf16 %v108_v19, %v107_v18  ;;  %v455_v26 = vpack.c.bf16 %v110_v24, %v109_v23  ;;  %v111_v27 = vld [vmem:[#allocation7 + $0x50] sm:$0xff]  ;;  %v112_v28 = vld [vmem:[#allocation7 + $0x58] sm:$0xff]  ;;  %v113_v30 = vld [vmem:[#allocation7 + $0x60] sm:$0xff] }
  0x3b   :  { %445 = vmatprep.subr.bf16.mxu0 %v607_v0  ;;  %84 = vrot.lane.b32.xlu0 %v77_v11, %s610_s0  ;;  %v78_v15 = vmul.f32 2.0, %v77_v11  ;;  %v458_v29 = vpack.c.bf16 %v112_v28, %v111_v27  ;;  %v114_v31 = vld [vmem:[#allocation7 + $0x68] sm:$0xff]  ;;  %v115_v33 = vld [vmem:[#allocation7 + $0x70] sm:$0xff]  ;;  %v116_v34 = vld [vmem:[#allocation7 + $0x78] sm:$0xff] }
  0x3c   :  { %v461_v32 = vpack.c.bf16 %v114_v31, %v113_v30  ;;  %v464_v35 = vpack.c.bf16 %v116_v34, %v115_v33  ;;  %v223_v45 = vld [vmem:[#allocation9] sm:$0xff]  ;;  %v224_v46 = vld [vmem:[#allocation9 + $0x8] sm:$0xff]  ;;  %v225_v47 = vld [vmem:[#allocation9 + $0x10] sm:$0xff] }
  0x3d   :  { %v79_v16 = vmul.f32 %v78_v15, %v77_v11  ;;  %v467_v48 = vpack.c.bf16 %v224_v46, %v223_v45  ;;  %v226_v49 = vld [vmem:[#allocation9 + $0x18] sm:$0xff]  ;;  %v227_v51 = vld [vmem:[#allocation9 + $0x20] sm:$0xff]  ;;  %v228_v52 = vld [vmem:[#allocation9 + $0x28] sm:$0xff] }
  0x3e   :  { %447 = vmatpush3.bf16.msra.mxu0 %v446_v12  ;;  %v470_v50 = vpack.c.bf16 %v226_v49, %v225_v47  ;;  %v473_v53 = vpack.c.bf16 %v228_v52, %v227_v51  ;;  %v229_v54 = vld [vmem:[#allocation9 + $0x30] sm:$0xff]  ;;  %v230_v55 = vld [vmem:[#allocation9 + $0x38] sm:$0xff]  ;;  %v231_v57 = vld [vmem:[#allocation9 + $0x40] sm:$0xff] }
  0x3f   :  { %448 = vmatprep.subr.bf16.mxu0 %v607_v0  ;;  %v333_v20 = vadd.f32 -1.0, %v79_v16  ;;  %468 = vmatpush3.bf16.msra.mxu1 %v467_v48  ;;  %v476_v56 = vpack.c.bf16 %v230_v55, %v229_v54  ;;  %v232_v58 = vld [vmem:[#allocation9 + $0x48] sm:$0xff]  ;;  %v233_v60 = vld [vmem:[#allocation9 + $0x50] sm:$0xff]  ;;  %v234_v61 = vld [vmem:[#allocation9 + $0x58] sm:$0xff] }
  0x40   :  { %469 = vmatprep.subr.bf16.mxu1 %v607_v0  ;;  %v479_v59 = vpack.c.bf16 %v232_v58, %v231_v57  ;;  %v482_v62 = vpack.c.bf16 %v234_v61, %v233_v60  ;;  %v235_v63 = vld [vmem:[#allocation9 + $0x60] sm:$0xff]  ;;  %v236_v1 = vld [vmem:[#allocation9 + $0x68] sm:$0xff]  ;;  %v237_v3 = vld [vmem:[#allocation9 + $0x70] sm:$0xff] }
  0x41   :  { %88 = vrot.lane.b32.xlu0 %v333_v20, %s611_s1  ;;  %v81_v21 = vmul.f32 %v333_v20, %v78_v15  ;;  %v485_v2 = vpack.c.bf16 %v236_v1, %v235_v63  ;;  %v238_v4 = vld [vmem:[#allocation9 + $0x78] sm:$0xff] }
  0x42   :  { %450 = vmatpush3.bf16.msra.mxu0 %v449_v17  ;;  %v488_v5 = vpack.c.bf16 %v238_v4, %v237_v3  ;;  %v334_v13 = vld [vmem:[%s748_s4] ss:$0 sm:$0xff]  ;;  %s613_s4 = smov [#allocation10]  }
  0x43   :  { %451 = vmatprep.subr.bf16.mxu0 %v607_v0  ;;  %v82_v25 = vsub.f32 %v81_v21, %v77_v11  ;;  %471 = vmatpush3.bf16.msra.mxu1 %v470_v50  ;;  %v337_v24 = vld [vmem:[%s751_s7] ss:$0 sm:$0xff]  ;;  %s323_s30 = sshll.u32 %s613_s4, 4  ;;  %s324_s30 = int_to_ptr.vmem [resolvable:$true] %s323_s30 }
  0x44   :  { %472 = vmatprep.subr.bf16.mxu1 %v607_v0  ;;  %p579_p11 = scmp.lt.s32.totalorder %s324_s30, %s324_s30 }
  0x45   :  { %92 = vrot.lane.b32.xlu1 %v82_v25, %s612_s6 }
  0x46   :  { %453 = vmatpush3.bf16.msra.mxu0 %v452_v22 }
  0x47   :  { %454 = vmatprep.subr.bf16.mxu0 %v607_v0  ;;  %474 = vmatpush3.bf16.msra.mxu1 %v473_v53 }
  0x48   :  { %475 = vmatprep.subr.bf16.mxu1 %v607_v0 }
  0x4a   :  { %456 = vmatpush3.bf16.msra.mxu0 %v455_v26 }
  0x4b   :  { %457 = vmatprep.subr.bf16.mxu0 %v607_v0  ;;  %477 = vmatpush3.bf16.msra.mxu1 %v476_v56 }
  0x4c   :  { %478 = vmatprep.subr.bf16.mxu1 %v607_v0 }
  0x4e   :  { %459 = vmatpush3.bf16.msra.mxu0 %v458_v29 }
  0x4f   :  { %460 = vmatprep.subr.bf16.mxu0 %v607_v0  ;;  %480 = vmatpush3.bf16.msra.mxu1 %v479_v59 }
  0x50   :  { %481 = vmatprep.subr.bf16.mxu1 %v607_v0 }
  0x52   :  { %462 = vmatpush3.bf16.msra.mxu0 %v461_v32 }
  0x53   :  { %463 = vmatprep.subr.bf16.mxu0 %v607_v0  ;;  %483 = vmatpush3.bf16.msra.mxu1 %v482_v62 }
  0x54   :  { %484 = vmatprep.subr.bf16.mxu1 %v607_v0 }
  0x56   :  { %465 = vmatpush3.bf16.msra.mxu0 %v464_v35 }
  0x57   :  { %486 = vmatpush3.bf16.msra.mxu1 %v485_v2 }
  0x58   :  { %487 = vmatprep.subr.bf16.mxu1 %v607_v0  ;;  %v335_v0 = vld [vmem:[%s749_s5] ss:$0 sm:$0xff]  ;;  %s574_s5 = scalar_lea.vmem %s324_s30, 128 }
  0x59   :  { %p575_p10 = scmp.ne.s32.totalorder %s324_s30, %s574_s5  ;;  %p580_p12 = scmp.lt.s32.totalorder %s574_s5, %s574_s5 }
  0x5b   :  { %489 = vmatpush3.bf16.msra.mxu1 %v488_v5  ;;  %p581_p13 = por %p580_p12, %p579_p11 }
  0x5d   :  { %p582_p0 = pnand %p581_p13, %p575_p10 }
  0xad   :  { %v85_v36 = vpop.permute.xlu0 %84 }
  0xae   :  { %v96_v37 = vsel %vm95_vm1, 1.0, %v85_v36 }
  0xb3   :  { %v89_v38 = vpop.permute.xlu0 %88 }
  0xb4   :  { %v98_v39 = vsel %vm97_vm2, %v96_v37, %v89_v38 }
  0xb7   :  { %v93_v40 = vpop.permute.xlu1 %92 }
  0xb8   :  { %v100_v41 = vsel %vm99_vm3, %v98_v39, %v93_v40 }
  0xb9   :  { %405 = vmatmul.mubr.f32.vlgmr.msra.gmra.mrb[0].mxu0 %v100_v41 }
 0x18c   :  { %v183_v42 = vpop.f32.mrb[0].mxu0 }
 0x18d   :  { %187 = vadd.xlane.f32.xlu1 %v183_v42  ;;  %v406_v43 = vpop.f32.mrb[1].mxu0  ;;  %v189_v44 = vmul.f32 %v183_v42, %v183_v42 }
 0x18f   :  { %190 = vadd.xlane.f32.xlu0 %v189_v44 }
 0x21a   :  { %v188_v6 = vpop.xlane.xlu1 %187 }
 0x21b   :  { %v192_v7 = vmul.f32 0.03125, %v188_v6 }
 0x21c   :  { %v191_v8 = vpop.xlane.xlu0 %190 }
 0x21d   :  { %v194_v9 = vmul.f32 %v192_v7, %v192_v7  ;;  %v193_v10 = vmul.f32 0.03125, %v191_v8  ;;  %v198_v15 = vsub.f32 %v183_v42, %v192_v7 }
 0x21f   :  { %v195_v11 = vsub.f32 %v193_v10, %v194_v9 }
 0x221   :  { %v196_v12 = vadd.f32 1e-05, %v195_v11 }
 0x223   :  { %502 = vrsqrt.f32 %v196_v12 }
 0x22d   :  { %v503_v14 = vpop.eup %502 }
 0x22e   :  { %v206_v16 = vmul.f32 %v503_v14, %v334_v13 }
 0x230   :  { %v207_v17 = vmul.f32 %v206_v16, %v198_v15 }
 0x232   :  { %v215_v18 = vadd.f32 %v335_v0, %v207_v17 }
 0x234   :  { %v336_v19 = vmul.f32 -1.442695, %v215_v18 }
 0x236   :  { %504 = vpow2.f32 %v336_v19 }
 0x240   :  { %v505_v20 = vpop.eup %504 }
 0x241   :  { %v219_v21 = vadd.f32 1.0, %v505_v20 }
 0x243   :  { %506 = vrcp.f32 %v219_v21 }
 0x24d   :  { %v507_v22 = vpop.eup %506 }
 0x24e   :  { %v222_v23 = vmul.f32 %v507_v22, %v215_v18 }
 0x250   :  { %440 = vmatmul.mubr.f32.vlgmr.msra.gmra.mrb[0].mxu1 %v222_v23 }
 0x323   :  { %v312_v25 = vpop.f32.mrb[0].mxu1 }
 0x324   :  { %v313_v26 = vadd.f32 %v337_v24, %v312_v25  ;;  %v441_v27 = vpop.f32.mrb[1].mxu1 }
 0x326   :  { %316 = vst [vmem:[#allocation10] sm:$0xff] %v313_v26 }
 0x327   :  { %585 = shalt.err (!%p582_p0)
}
 0x328   :  { %s586_s9 = scalar_lea.hbm %s752_s8, 128 }
 0x329   :  { %p587_p1 = scmp.ne.s32.totalorder %s752_s8, %s586_s9  ;;  %p590_p2 = scmp.lt.u32.totalorder %s586_s9, %s752_s8 }
 0x32b   :  { %p592_p3 = pnand %p590_p2, %p587_p1 }
 0x32d   :  { %595 = shalt.err (!%p592_p3)
}
 0x32e   :  { %326 = dma.vmem_to_hbm [thread:$0]  %s324_s30, 128, %s752_s8, [#allocation6]  }
 0x32f   :  { %600 = dma.done.wait [#allocation6], 128  }
 0x330   :  { %601 = vsyncadd [#allocation6], 4294967168 }
 0x331   :  { %330 = vsyncpa [#allocation5], 1 }
 0x332   :  { %331 = vsyncpa [#allocation8], 1 }
 0x333   :  { %332 = vsyncpa [#allocation6], 1 }

// kernel: tpu_custom_call.1
= control target key start
LH: loop header
LB: loop body
LE: loop exit
PB: predicated region body
PF: predicated region fallthrough
CT: control target
= control target key end

     0   :  { %15 = vsyncpa [#allocation5], 0  ;;  %s744_s0 = inlined_call_operand.<no memory space> [shape: f32[1,1], index: 0, kind: input, shape index: {}]   ;;  %s745_s1 = inlined_call_operand.<no memory space> [shape: f32[1,1], index: 1, kind: input, shape index: {}]   ;;  %s746_s2 = inlined_call_operand.hbm [shape: f32[8,32], index: 2, kind: input, shape index: {}]   ;;  %s747_s3 = inlined_call_operand.hbm [shape: f32[128,128], index: 3, kind: input, shape index: {}]   ;;  %s748_s4 = inlined_call_operand.vmem [shape: f32[1,128], index: 4, kind: input, shape index: {}]   ;;  %s749_s5 = inlined_call_operand.vmem [shape: f32[1,128], index: 5, kind: input, shape index: {}]   ;;  %s750_s6 = inlined_call_operand.hbm [shape: f32[128,128], index: 6, kind: input, shape index: {}]   ;;  %s751_s7 = inlined_call_operand.vmem [shape: f32[1,128], index: 7, kind: input, shape index: {}]   ;;  %s752_s8 = inlined_call_operand.hbm [shape: f32[8,128], index: 8, kind: output, shape index: {}]  }
   0x1   :  { %16 = vsyncpa [#allocation8], 0 }
   0x2   :  { %17 = vsyncpa [#allocation6], 0  ;;  %s602_s27 = smov [#allocation7]   ;;  %s508_s9 = scalar_lea.hbm %s747_s3, 2048 }
   0x3   :  { %s37_s28 = sshll.u32 %s602_s27, 4  ;;  %p509_p0 = scmp.ne.s32.totalorder %s747_s3, %s508_s9  ;;  %s38_s28 = int_to_ptr.vmem [resolvable:$true] %s37_s28 }
   0x4   :  { %p512_p1 = scmp.lt.u32.totalorder %s508_s9, %s747_s3 }
   0x6   :  { %p514_p2 = pnand %p512_p1, %p509_p0 }
   0x8   :  { %517 = shalt.err (!%p514_p2)
}
   0x9   :  { %s518_s14 = scalar_lea.vmem %s38_s28, 2048  ;;  %p523_p4 = scmp.lt.s32.totalorder %s38_s28, %s38_s28 }
   0xa   :  { %p519_p3 = scmp.ne.s32.totalorder %s38_s28, %s518_s14  ;;  %p524_p5 = scmp.lt.s32.totalorder %s518_s14, %s518_s14 }
   0xc   :  { %p525_p6 = por %p524_p5, %p523_p4 }
   0xe   :  { %p526_p7 = pnand %p525_p6, %p519_p3 }
  0x10   :  { %529 = shalt.err (!%p526_p7)
}
  0x11   :  { %s603_s15 = smov 128   ;;  %s604_s16 = smov 8  }
  0x12   :  { %43 = dma.hbm_to_vmem [thread:$0]  %s747_s3, 2048, %s38_s28, [#allocation8], %s603_s15, %s603_s15, %s604_s16  }
  0x13   :  { %s605_s19 = smov [#allocation4]   ;;  %s606_s21 = smov [#allocation9]  }
  0x14   :  { %s28_s20 = sshll.u32 %s605_s19, 4  ;;  %s53_s22 = sshll.u32 %s606_s21, 4  ;;  %s29_s20 = int_to_ptr.vmem [resolvable:$true] %s28_s20  ;;  %s54_s22 = int_to_ptr.vmem [resolvable:$true] %s53_s22 }
  0x15   :  { %s530_s25 = scalar_lea.hbm %s746_s2, 128 }
  0x16   :  { %p531_p8 = scmp.ne.s32.totalorder %s746_s2, %s530_s25  ;;  %p534_p9 = scmp.lt.u32.totalorder %s530_s25, %s746_s2 }
  0x18   :  { %p536_p10 = pnand %p534_p9, %p531_p8 }
  0x1a   :  { %539 = shalt.err (!%p536_p10)
}
  0x1b   :  { %s540_s3 = scalar_lea.vmem %s29_s20, 128  ;;  %p545_p12 = scmp.lt.s32.totalorder %s29_s20, %s29_s20 }
  0x1c   :  { %p541_p11 = scmp.ne.s32.totalorder %s29_s20, %s540_s3  ;;  %p546_p13 = scmp.lt.s32.totalorder %s540_s3, %s540_s3 }
  0x1e   :  { %p547_p0 = por %p546_p13, %p545_p12 }
  0x20   :  { %p548_p1 = pnand %p547_p0, %p541_p11 }
  0x22   :  { %551 = shalt.err (!%p548_p1)
}
  0x23   :  { %31 = dma.hbm_to_vmem [thread:$0]  %s746_s2, 128, %s29_s20, [#allocation5]  }
  0x24   :  { %s552_s12 = scalar_lea.hbm %s750_s6, 2048 }
  0x25   :  { %p553_p2 = scmp.ne.s32.totalorder %s750_s6, %s552_s12  ;;  %p556_p3 = scmp.lt.u32.totalorder %s552_s12, %s750_s6 }
  0x27   :  { %p558_p4 = pnand %p556_p3, %p553_p2 }
  0x29   :  { %561 = shalt.err (!%p558_p4)
}
  0x2a   :  { %s562_s19 = scalar_lea.vmem %s54_s22, 2048  ;;  %p567_p6 = scmp.lt.s32.totalorder %s54_s22, %s54_s22 }
  0x2b   :  { %p563_p5 = scmp.ne.s32.totalorder %s54_s22, %s562_s19  ;;  %p568_p7 = scmp.lt.s32.totalorder %s562_s19, %s562_s19 }
  0x2d   :  { %p569_p8 = por %p568_p7, %p567_p6 }
  0x2f   :  { %p570_p9 = pnand %p569_p8, %p563_p5 }
  0x31   :  { %573 = shalt.err (!%p570_p9)
}
  0x32   :  { %59 = dma.hbm_to_vmem [thread:$0]  %s750_s6, 2048, %s54_s22, [#allocation8], %s603_s15, %s603_s15, %s604_s16  }
  0x33   :  { %596 = dma.done.wait [#allocation5], 128  }
  0x34   :  { %597 = vsyncadd [#allocation5], 4294967168 }
  0x35   :  { %598 = dma.done.wait [#allocation8], 4096  }
  0x36   :  { %599 = vsyncadd [#allocation8], 4294963200  ;;  %v607_v0 = vmov 0.0|0.0   ;;  %v73_v1 = vstv %s744_s0  ;;  %v71_v2 = vld [vmem:[#allocation4] sm:$0xff]  ;;  %v76_v3 = vstv %s745_s1  ;;  %v101_v4 = vld [vmem:[#allocation7] sm:$0xff]  ;;  %vm608_vm0 = vmmov 0  }
  0x37   :  { %442 = vmatprep.subr.bf16.mxu0 %v607_v0  ;;  %466 = vmatprep.subr.bf16.mxu1 %v607_v0  ;;  %v102_v5 = vld [vmem:[#allocation7 + $0x8] sm:$0xff]  ;;  %v74_v6 = vmul.f32 %v73_v1, %v71_v2  ;;  %v103_v8 = vld [vmem:[#allocation7 + $0x10] sm:$0xff]  ;;  %v104_v9 = vld [vmem:[#allocation7 + $0x18] sm:$0xff]  ;;  %v609_v10 = vmov 0.0   ;;  %s610_s0 = smov 32   ;;  %s611_s1 = smov 64  }
  0x38   :  { %v443_v7 = vpack.c.bf16 %v102_v5, %v101_v4  ;;  %404 = vmatprep.mubr.msk.f32.mxu0 %vm608_vm0, %v609_v10  ;;  %439 = vmatprep.mubr.msk.f32.mxu1 %vm608_vm0, %v609_v10  ;;  %v446_v12 = vpack.c.bf16 %v104_v9, %v103_v8  ;;  %v105_v13 = vld [vmem:[#allocation7 + $0x20] sm:$0xff]  ;;  %v106_v14 = vld [vmem:[#allocation7 + $0x28] sm:$0xff]  ;;  %v107_v18 = vld [vmem:[#allocation7 + $0x30] sm:$0xff]  ;;  %s612_s6 = smov 96   ;;  %vm95_vm1 = vcmask 261120   ;;  %vm97_vm2 = vcmask 523264  }
  0x39   :  { %v77_v11 = vadd.f32 %v76_v3, %v74_v6  ;;  %v449_v17 = vpack.c.bf16 %v106_v14, %v105_v13  ;;  %v108_v19 = vld [vmem:[#allocation7 + $0x38] sm:$0xff]  ;;  %v109_v23 = vld [vmem:[#allocation7 + $0x40] sm:$0xff]  ;;  %v110_v24 = vld [vmem:[#allocation7 + $0x48] sm:$0xff]  ;;  %vm99_vm3 = vcmask 785408  }
  0x3a   :  { %444 = vmatpush3.bf16.msra.mxu0 %v443_v7  ;;  %v452_v22 = vpack.c.bf16 %v108_v19, %v107_v18  ;;  %v455_v26 = vpack.c.bf16 %v110_v24, %v109_v23  ;;  %v111_v27 = vld [vmem:[#allocation7 + $0x50] sm:$0xff]  ;;  %v112_v28 = vld [vmem:[#allocation7 + $0x58] sm:$0xff]  ;;  %v113_v30 = vld [vmem:[#allocation7 + $0x60] sm:$0xff] }
  0x3b   :  { %445 = vmatprep.subr.bf16.mxu0 %v607_v0  ;;  %84 = vrot.lane.b32.xlu0 %v77_v11, %s610_s0  ;;  %v78_v15 = vmul.f32 2.0, %v77_v11  ;;  %v458_v29 = vpack.c.bf16 %v112_v28, %v111_v27  ;;  %v114_v31 = vld [vmem:[#allocation7 + $0x68] sm:$0xff]  ;;  %v115_v33 = vld [vmem:[#allocation7 + $0x70] sm:$0xff]  ;;  %v116_v34 = vld [vmem:[#allocation7 + $0x78] sm:$0xff] }
  0x3c   :  { %v461_v32 = vpack.c.bf16 %v114_v31, %v113_v30  ;;  %v464_v35 = vpack.c.bf16 %v116_v34, %v115_v33  ;;  %v223_v45 = vld [vmem:[#allocation9] sm:$0xff]  ;;  %v224_v46 = vld [vmem:[#allocation9 + $0x8] sm:$0xff]  ;;  %v225_v47 = vld [vmem:[#allocation9 + $0x10] sm:$0xff] }
  0x3d   :  { %v79_v16 = vmul.f32 %v78_v15, %v77_v11  ;;  %v467_v48 = vpack.c.bf16 %v224_v46, %v223_v45  ;;  %v226_v49 = vld [vmem:[#allocation9 + $0x18] sm:$0xff]  ;;  %v227_v51 = vld [vmem:[#allocation9 + $0x20] sm:$0xff]  ;;  %v228_v52 = vld [vmem:[#allocation9 + $0x28] sm:$0xff] }
  0x3e   :  { %447 = vmatpush3.bf16.msra.mxu0 %v446_v12  ;;  %v470_v50 = vpack.c.bf16 %v226_v49, %v225_v47  ;;  %v473_v53 = vpack.c.bf16 %v228_v52, %v227_v51  ;;  %v229_v54 = vld [vmem:[#allocation9 + $0x30] sm:$0xff]  ;;  %v230_v55 = vld [vmem:[#allocation9 + $0x38] sm:$0xff]  ;;  %v231_v57 = vld [vmem:[#allocation9 + $0x40] sm:$0xff] }
  0x3f   :  { %448 = vmatprep.subr.bf16.mxu0 %v607_v0  ;;  %v333_v20 = vadd.f32 -1.0, %v79_v16  ;;  %468 = vmatpush3.bf16.msra.mxu1 %v467_v48  ;;  %v476_v56 = vpack.c.bf16 %v230_v55, %v229_v54  ;;  %v232_v58 = vld [vmem:[#allocation9 + $0x48] sm:$0xff]  ;;  %v233_v60 = vld [vmem:[#allocation9 + $0x50] sm:$0xff]  ;;  %v234_v61 = vld [vmem:[#allocation9 + $0x58] sm:$0xff] }
  0x40   :  { %469 = vmatprep.subr.bf16.mxu1 %v607_v0  ;;  %v479_v59 = vpack.c.bf16 %v232_v58, %v231_v57  ;;  %v482_v62 = vpack.c.bf16 %v234_v61, %v233_v60  ;;  %v235_v63 = vld [vmem:[#allocation9 + $0x60] sm:$0xff]  ;;  %v236_v1 = vld [vmem:[#allocation9 + $0x68] sm:$0xff]  ;;  %v237_v3 = vld [vmem:[#allocation9 + $0x70] sm:$0xff] }
  0x41   :  { %88 = vrot.lane.b32.xlu0 %v333_v20, %s611_s1  ;;  %v81_v21 = vmul.f32 %v333_v20, %v78_v15  ;;  %v485_v2 = vpack.c.bf16 %v236_v1, %v235_v63  ;;  %v238_v4 = vld [vmem:[#allocation9 + $0x78] sm:$0xff] }
  0x42   :  { %450 = vmatpush3.bf16.msra.mxu0 %v449_v17  ;;  %v488_v5 = vpack.c.bf16 %v238_v4, %v237_v3  ;;  %v334_v13 = vld [vmem:[%s748_s4] ss:$0 sm:$0xff]  ;;  %s613_s4 = smov [#allocation10]  }
  0x43   :  { %451 = vmatprep.subr.bf16.mxu0 %v607_v0  ;;  %v82_v25 = vsub.f32 %v81_v21, %v77_v11  ;;  %471 = vmatpush3.bf16.msra.mxu1 %v470_v50  ;;  %v337_v24 = vld [vmem:[%s751_s7] ss:$0 sm:$0xff]  ;;  %s323_s30 = sshll.u32 %s613_s4, 4  ;;  %s324_s30 = int_to_ptr.vmem [resolvable:$true] %s323_s30 }
  0x44   :  { %472 = vmatprep.subr.bf16.mxu1 %v607_v0  ;;  %p579_p11 = scmp.lt.s32.totalorder %s324_s30, %s324_s30 }
  0x45   :  { %92 = vrot.lane.b32.xlu1 %v82_v25, %s612_s6 }
  0x46   :  { %453 = vmatpush3.bf16.msra.mxu0 %v452_v22 }
  0x47   :  { %454 = vmatprep.subr.bf16.mxu0 %v607_v0  ;;  %474 = vmatpush3.bf16.msra.mxu1 %v473_v53 }
  0x48   :  { %475 = vmatprep.subr.bf16.mxu1 %v607_v0 }
  0x4a   :  { %456 = vmatpush3.bf16.msra.mxu0 %v455_v26 }
  0x4b   :  { %457 = vmatprep.subr.bf16.mxu0 %v607_v0  ;;  %477 = vmatpush3.bf16.msra.mxu1 %v476_v56 }
  0x4c   :  { %478 = vmatprep.subr.bf16.mxu1 %v607_v0 }
  0x4e   :  { %459 = vmatpush3.bf16.msra.mxu0 %v458_v29 }
  0x4f   :  { %460 = vmatprep.subr.bf16.mxu0 %v607_v0  ;;  %480 = vmatpush3.bf16.msra.mxu1 %v479_v59 }
  0x50   :  { %481 = vmatprep.subr.bf16.mxu1 %v607_v0 }
  0x52   :  { %462 = vmatpush3.bf16.msra.mxu0 %v461_v32 }
  0x53   :  { %463 = vmatprep.subr.bf16.mxu0 %v607_v0  ;;  %483 = vmatpush3.bf16.msra.mxu1 %v482_v62 }
  0x54   :  { %484 = vmatprep.subr.bf16.mxu1 %v607_v0 }
  0x56   :  { %465 = vmatpush3.bf16.msra.mxu0 %v464_v35 }
  0x57   :  { %486 = vmatpush3.bf16.msra.mxu1 %v485_v2 }
  0x58   :  { %487 = vmatprep.subr.bf16.mxu1 %v607_v0  ;;  %v335_v0 = vld [vmem:[%s749_s5] ss:$0 sm:$0xff]  ;;  %s574_s5 = scalar_lea.vmem %s324_s30, 128 }
  0x59   :  { %p575_p10 = scmp.ne.s32.totalorder %s324_s30, %s574_s5  ;;  %p580_p12 = scmp.lt.s32.totalorder %s574_s5, %s574_s5 }
  0x5b   :  { %489 = vmatpush3.bf16.msra.mxu1 %v488_v5  ;;  %p581_p13 = por %p580_p12, %p579_p11 }
  0x5d   :  { %p582_p0 = pnand %p581_p13, %p575_p10 }
  0xad   :  { %v85_v36 = vpop.permute.xlu0 %84 }
  0xae   :  { %v96_v37 = vsel %vm95_vm1, 1.0, %v85_v36 }
  0xb3   :  { %v89_v38 = vpop.permute.xlu0 %88 }
  0xb4   :  { %v98_v39 = vsel %vm97_vm2, %v96_v37, %v89_v38 }
  0xb7   :  { %v93_v40 = vpop.permute.xlu1 %92 }
  0xb8   :  { %v100_v41 = vsel %vm99_vm3, %v98_v39, %v93_v40 }
  0xb9   :  { %405 = vmatmul.mubr.f32.vlgmr.msra.gmra.mrb[0].mxu0 %v100_v41 }
 0x18c   :  { %v183_v42 = vpop.f32.mrb[0].mxu0 }
 0x18d   :  { %187 = vadd.xlane.f32.xlu1 %v183_v42  ;;  %v406_v43 = vpop.f32.mrb[1].mxu0  ;;  %v189_v44 = vmul.f32 %v183_v42, %v183_v42 }
 0x18f   :  { %190 = vadd.xlane.f32.xlu0 %v189_v44 }
 0x21a   :  { %v188_v6 = vpop.xlane.xlu1 %187 }
 0x21b   :  { %v192_v7 = vmul.f32 0.03125, %v188_v6 }
 0x21c   :  { %v191_v8 = vpop.xlane.xlu0 %190 }
 0x21d   :  { %v194_v9 = vmul.f32 %v192_v7, %v192_v7  ;;  %v193_v10 = vmul.f32 0.03125, %v191_v8  ;;  %v198_v15 = vsub.f32 %v183_v42, %v192_v7 }
 0x21f   :  { %v195_v11 = vsub.f32 %v193_v10, %v194_v9 }
 0x221   :  { %v196_v12 = vadd.f32 1e-05, %v195_v11 }
 0x223   :  { %502 = vrsqrt.f32 %v196_v12 }
 0x22d   :  { %v503_v14 = vpop.eup %502 }
 0x22e   :  { %v206_v16 = vmul.f32 %v503_v14, %v334_v13 }
 0x230   :  { %v207_v17 = vmul.f32 %v206_v16, %v198_v15 }
 0x232   :  { %v215_v18 = vadd.f32 %v335_v0, %v207_v17 }
 0x234   :  { %v336_v19 = vmul.f32 -1.442695, %v215_v18 }
 0x236   :  { %504 = vpow2.f32 %v336_v19 }
 0x240   :  { %v505_v20 = vpop.eup %504 }
 0x241   :  { %v219_v21 = vadd.f32 1.0, %v505_v20 }
 0x243   :  { %506 = vrcp.f32 %v219_v21 }
 0x24d   :  { %v507_v22 = vpop.eup %506 }
 0x24e   :  { %v222_v23 = vmul.f32 %v507_v22, %v215_v18 }
 0x250   :  { %440 = vmatmul.mubr.f32.vlgmr.msra.gmra.mrb[0].mxu1 %v222_v23 }
 0x323   :  { %v312_v25 = vpop.f32.mrb[0].mxu1 }
 0x324   :  { %v313_v26 = vadd.f32 %v337_v24, %v312_v25  ;;  %v441_v27 = vpop.f32.mrb[1].mxu1 }
 0x326   :  { %316 = vst [vmem:[#allocation10] sm:$0xff] %v313_v26 }
 0x327   :  { %585 = shalt.err (!%p582_p0)
}
 0x328   :  { %s586_s9 = scalar_lea.hbm %s752_s8, 128 }
 0x329   :  { %p587_p1 = scmp.ne.s32.totalorder %s752_s8, %s586_s9  ;;  %p590_p2 = scmp.lt.u32.totalorder %s586_s9, %s752_s8 }
 0x32b   :  { %p592_p3 = pnand %p590_p2, %p587_p1 }
 0x32d   :  { %595 = shalt.err (!%p592_p3)
}
 0x32e   :  { %326 = dma.vmem_to_hbm [thread:$0]  %s324_s30, 128, %s752_s8, [#allocation6]  }
 0x32f   :  { %600 = dma.done.wait [#allocation6], 128  }
 0x330   :  { %601 = vsyncadd [#allocation6], 4294967168 }
 0x331   :  { %330 = vsyncpa [#allocation5], 1 }
 0x332   :  { %331 = vsyncpa [#allocation8], 1 }
 0x333   :  { %332 = vsyncpa [#allocation6], 1 }

</bundles_post_ra>
